<compile_context>
chip_gen: v6e
topology: v6e:2x2x1
jax: 0.10.0
libtpu: 0.0.40
codegen_flags: <defaults>
</compile_context>

<pallas_src>
import jax
import jax.numpy as jnp
from jax.experimental import pallas as pl
from jax.experimental.pallas import tpu as pltpu

INPUT_SIZE = 10
NUM_CLASSES = 3

TILE_B_MAX = 2048   # batch tile upper bound (multiple of 8)


def _round_up(x, m):
    return ((x + m - 1) // m) * m


def _pick_batch_tile(batch):
    """Pick (tile_b, padded_batch): tile_b <= TILE_B_MAX, multiple of 8,
    chosen to minimize batch padding (largest tile wins ties)."""
    b8 = _round_up(batch, 8)
    if b8 <= TILE_B_MAX:
        return b8, b8
    best_tile = TILE_B_MAX
    best_pad = _round_up(b8, TILE_B_MAX)
    for t in range(TILE_B_MAX, 7, -8):
        pad = _round_up(b8, t)
        if pad < best_pad:
            best_tile, best_pad = t, pad
        if pad == b8:               # zero waste with the largest such tile
            break
    return best_tile, best_pad


def linear_kernel(x_ref, w_ref, b_ref, o_ref):
    # x_ref: (tile_b, In)  f32  — tiled over batch
    # w_ref: (In, Out)     f32  — resident across grid steps (Mosaic pads in VMEM)
    # b_ref: (1, Out)      f32  — resident
    # o_ref: (tile_b, Out) f32  — only real logits are written back
    acc = jnp.dot(
        x_ref[...], w_ref[...],
        preferred_element_type=jnp.float32,
        precision=jax.lax.Precision.HIGHEST,
    )
    o_ref[...] = acc + b_ref[...]


def linear_classifier(x, weight, bias):
    """x: (B, In) f32; weight: (Out, In) f32 (PyTorch convention); bias: (Out,) f32."""
    B, In = x.shape
    Out = weight.shape[0]

    tile_b, B_pad = _pick_batch_tile(B)

    # ---- wrapper-side plumbing (plain JAX, no lane padding, no dtype cast) ----
    x_p = x.astype(jnp.float32)
    if B_pad != B:
        x_p = jnp.pad(x_p, ((0, B_pad - B), (0, 0)))   # padded rows -> bias-only, sliced off
    w_t = weight.T.astype(jnp.float32)                 # (In, Out), 30 elements
    b2 = bias.reshape(1, Out).astype(jnp.float32)

    grid = (B_pad // tile_b,)

    out = pl.pallas_call(
        linear_kernel,
        out_shape=jax.ShapeDtypeStruct((B_pad, Out), jnp.float32),
        grid_spec=pltpu.PrefetchScalarGridSpec(
            num_scalar_prefetch=0,
            grid=grid,
            in_specs=[
                # x: natural last dim (In == full array dim, so un-padded is legal)
                pl.BlockSpec((tile_b, In), lambda i: (i, 0)),
                pl.BlockSpec((In, Out), lambda i: (0, 0)),     # W^T: resident
                pl.BlockSpec((1, Out), lambda i: (0, 0)),      # bias: resident
            ],
            # Narrow (tile_b, Out) writeback: only real logits hit HBM.
            out_specs=pl.BlockSpec((tile_b, Out), lambda i: (i, 0)),
        ),
        compiler_params=pltpu.CompilerParams(
            dimension_semantics=("parallel",),   # batch steps independent
        ),
    )(x_p, w_t, b2)

    if B_pad != B:
        out = out[:B]
    return out.astype(x.dtype)


if __name__ == "__main__":
    key = jax.random.PRNGKey(0)
    kx, kw, kb = jax.random.split(key, 3)

    batch = 8
    x = jax.random.normal(kx, (batch, INPUT_SIZE), dtype=jnp.float32)

    # Deterministic parameter init mimicking nn.Linear's default:
    # U(-1/sqrt(in_features), 1/sqrt(in_features))
    bound = 1.0 / (INPUT_SIZE ** 0.5)
    weight = jax.random.uniform(
        kw, (NUM_CLASSES, INPUT_SIZE), dtype=jnp.float32,
        minval=-bound, maxval=bound)
    bias = jax.random.uniform(
        kb, (NUM_CLASSES,), dtype=jnp.float32, minval=-bound, maxval=bound)

    out = linear_classifier(x, weight, bias)
    out = jax.block_until_ready(out)
    assert out.shape == (batch, NUM_CLASSES)

    # Full-f32 compute in the kernel now -> tight check against the PyTorch-
    # equivalent f32 forward.
    ref_f32 = x @ weight.T + bias
    assert jnp.allclose(out, ref_f32, atol=5e-3, rtol=5e-3)

    print("KERNEL_OK")
</pallas_src>

<mosaic_0001>
module attributes {stable_mosaic.version = 11 : i64} {
  func.func @linear_kernel(%arg0: i32, %arg1: memref<8x10xf32, #tpu.memory_space<vmem>>, %arg2: memref<10x3xf32, #tpu.memory_space<vmem>>, %arg3: memref<1x3xf32, #tpu.memory_space<vmem>>, %arg4: memref<8x3xf32, #tpu.memory_space<vmem>>) attributes {dimension_semantics = [#tpu.dimension_semantics<parallel>], iteration_bounds = array<i64: 1>, scalar_prefetch = 0 : i64, scratch_operands = 0 : i64, tpu.core_type = #tpu.core_type<tc>, window_params = [{transform_indices = @transform_0, window_bounds = array<i64: 8, 10>}, {pipeline_mode = #tpu.pipeline_mode<synchronous>, transform_indices = @transform_1, window_bounds = array<i64: 10, 3>}, {pipeline_mode = #tpu.pipeline_mode<synchronous>, transform_indices = @transform_2, window_bounds = array<i64: 1, 3>}, {transform_indices = @transform_3, window_bounds = array<i64: 8, 3>}]} {
    %c0 = arith.constant 0 : index
    %c0_0 = arith.constant 0 : index
    %0 = vector.load %arg1[%c0, %c0_0] : memref<8x10xf32, #tpu.memory_space<vmem>>, vector<8x10xf32>
    %c0_1 = arith.constant 0 : index
    %c0_2 = arith.constant 0 : index
    %1 = vector.load %arg2[%c0_1, %c0_2] : memref<10x3xf32, #tpu.memory_space<vmem>>, vector<10x3xf32>
    %cst = arith.constant dense<0.000000e+00> : vector<8x3xf32>
    %2 = tpu.matmul %0, %1, %cst {dimension_numbers = #tpu.dot_dimension_numbers<[1], [0], [0], [1], [0, 0, 1, 1], [], []>, precision = #tpu.contract_precision<fp32>} : vector<8x10xf32>, vector<10x3xf32>, vector<8x3xf32> -> vector<8x3xf32>
    %c0_3 = arith.constant 0 : index
    %c0_4 = arith.constant 0 : index
    %3 = vector.load %arg3[%c0_3, %c0_4] : memref<1x3xf32, #tpu.memory_space<vmem>>, vector<1x3xf32>
    %4 = vector.broadcast %3 : vector<1x3xf32> to vector<8x3xf32>
    %5 = arith.addf %2, %4 : vector<8x3xf32>
    %c0_5 = arith.constant 0 : index
    %c0_6 = arith.constant 0 : index
    %6 = vector.load %arg4[%c0_5, %c0_6] : memref<8x3xf32, #tpu.memory_space<vmem>>, vector<8x3xf32>
    tpu.vector_store %arg4[%c0_5, %c0_6], %5 {strides = array<i32>} : memref<8x3xf32, #tpu.memory_space<vmem>>, vector<8x3xf32>,
    return
  }
  func.func @transform_0(%arg0: i32) -> (i32, i32) {
    %c0_i32 = arith.constant 0 : i32
    %c0_i32_0 = arith.constant 0 : i32
    return %arg0, %c0_i32 : i32, i32
  }
  func.func @transform_1(%arg0: i32) -> (i32, i32) {
    %c0_i32 = arith.constant 0 : i32
    %c0_i32_0 = arith.constant 0 : i32
    %c0_i32_1 = arith.constant 0 : i32
    return %c0_i32, %c0_i32_0 : i32, i32
  }
  func.func @transform_2(%arg0: i32) -> (i32, i32) {
    %c0_i32 = arith.constant 0 : i32
    %c0_i32_0 = arith.constant 0 : i32
    %c0_i32_1 = arith.constant 0 : i32
    return %c0_i32, %c0_i32_0 : i32, i32
  }
  func.func @transform_3(%arg0: i32) -> (i32, i32) {
    %c0_i32 = arith.constant 0 : i32
    %c0_i32_0 = arith.constant 0 : i32
    return %arg0, %c0_i32 : i32, i32
  }
}

</mosaic_0001>

<bundles_post_ra>
// kernel: tpu_custom_call.1
= control target key start
LH: loop header
LB: loop body
LE: loop exit
PB: predicated region body
PF: predicated region fallthrough
CT: control target
= control target key end

     0   :  { %vm28_vm0 = vcmask 1041408   ;;  %vm24_vm1 = vcmask 80896   ;;  %v560_v0 = vmov 0.0   ;;  %vm561_vm2 = vmmov 0   ;;  %s603_s1 = inlined_call_operand.vmem [shape: f32[10,3], index: 1, kind: input, shape index: {}]   ;;  %s604_s0 = inlined_call_operand.vmem [shape: f32[8,10], index: 0, kind: input, shape index: {}]   ;;  %s605_s2 = inlined_call_operand.vmem [shape: f32[1,3], index: 2, kind: input, shape index: {}]   ;;  %s606_s3 = inlined_call_operand.vmem [shape: f32[8,3], index: 3, kind: output, shape index: {}]  }
   0x1   :  { %516 = vmatprep.subr.mxu0 %v560_v0  ;;  %v16_v1 = vld [vmem:[%s603_s1 + $0x8] sm:$0x3]  ;;  %v15_v2 = vld [vmem:[%s603_s1] sm:$0xff]  ;;  %520 = vmatprep.mubr.msk.f32.mxu0 %vm561_vm2, %v560_v0  ;;  %vm491_vm3 = vcmask 23552  }
   0x2   :  { %v14_v3 = vld [vmem:[%s604_s0] sm:$0xff]  ;;  %v30_v4 = vsel %vm28_vm0, %v16_v1, 0  ;;  %v64_v5 = vand.u32 4294901760, %v15_v2  ;;  %523 = vmatprep.subr.mxu1 %v560_v0  ;;  %527 = vmatprep.mubr.msk.f32.mxu1 %vm561_vm2, %v560_v0 }
   0x3   :  { %v26_v6 = vsel %vm24_vm1, %v14_v3, 0  ;;  %v61_v7 = vand.u32 4294901760, %v30_v4  ;;  %v497_v21 = vld [vmem:[%s605_s2] ss:$0 sm:$0xff] }
   0x4   :  { %v99_v8 = vand.u32 4294901760, %v26_v6  ;;  %v146_v9 = vsub.f32 %v15_v2, %v64_v5 }
   0x5   :  { %517 = vmatpush3.msra.mxu0 %v61_v7  ;;  %v139_v11 = vsub.f32 %v30_v4, %v61_v7 }
   0x6   :  { %v100_v10 = vsub.f32 %v26_v6, %v99_v8  ;;  %518 = vmatprep.subr.mxu0 %v560_v0  ;;  %v147_v12 = vand.u32 4294901760, %v146_v9 }
   0x7   :  { %519 = vmatpush3.msra.mxu0 %v64_v5  ;;  %v140_v14 = vand.u32 4294901760, %v139_v11 }
   0x8   :  { %v101_v13 = vand.u32 4294901760, %v100_v10  ;;  %530 = vmatprep.subr.mxu0 %v560_v0  ;;  %v148_v15 = vsub.f32 %v146_v9, %v147_v12 }
   0x9   :  { %v141_v17 = vsub.f32 %v139_v11, %v140_v14 }
   0xa   :  { %v102_v16 = vsub.f32 %v100_v10, %v101_v13  ;;  %v149_v20 = vand.u32 4294901760, %v148_v15 }
   0xb   :  { %v142_v19 = vand.u32 4294901760, %v141_v17 }
   0xc   :  { %v103_v18 = vand.u32 4294901760, %v102_v16 }
   0xd   :  { %524 = vmatpush3.msra.mxu1 %v142_v19 }
   0xe   :  { %521 = vmatmul.mubr.f32.vlgmr.msra.gmra.mxu0 %v103_v18  ;;  %525 = vmatprep.subr.mxu1 %v560_v0 }
   0xf   :  { %531 = vmatpush3.msra.mxu0 %v139_v11  ;;  %526 = vmatpush3.msra.mxu1 %v149_v20 }
  0x10   :  { %532 = vmatprep.subr.mxu0 %v560_v0  ;;  %528 = vmatmul.mubr.f32.vlgmr.msra.gmra.mxu1 %v99_v8 }
  0x11   :  { %533 = vmatpush3.msra.mxu0 %v146_v9  ;;  %534 = vmatprep.mubr.msk.f32.mxu0 %vm561_vm2, %v560_v0 }
  0x12   :  { %537 = vmatprep.subr.mxu1 %v560_v0  ;;  %535 = vmatmul.mubr.f32.vlgmr.msra.gmra.mxu0 %v100_v10 }
  0x13   :  { %538 = vmatpush3.msra.mxu1 %v61_v7  ;;  %544 = vmatprep.subr.mxu0 %v560_v0 }
  0x14   :  { %539 = vmatprep.subr.mxu1 %v560_v0  ;;  %545 = vmatpush3.msra.mxu0 %v140_v14 }
  0x15   :  { %540 = vmatpush3.msra.mxu1 %v64_v5  ;;  %541 = vmatprep.mubr.msk.f32.mxu1 %vm561_vm2, %v560_v0 }
  0x16   :  { %546 = vmatprep.subr.mxu0 %v560_v0  ;;  %542 = vmatmul.mubr.f32.vlgmr.msra.gmra.mxu1 %v101_v13 }
  0x17   :  { %547 = vmatpush3.msra.mxu0 %v147_v12  ;;  %548 = vmatprep.mubr.msk.f32.mxu0 %vm561_vm2, %v560_v0 }
  0x18   :  { %551 = vmatprep.subr.mxu1 %v560_v0  ;;  %549 = vmatmul.mubr.f32.vlgmr.msra.gmra.mxu0 %v99_v8 }
  0x19   :  { %552 = vmatpush3.msra.mxu1 %v61_v7  ;;  %555 = vmatprep.mubr.msk.f32.mxu1 %vm561_vm2, %v560_v0 }
  0x1a   :  { %553 = vmatprep.subr.mxu1 %v560_v0 }
  0x1b   :  { %554 = vmatpush3.msra.mxu1 %v64_v5 }
  0x1c   :  { %556 = vmatmul.mubr.f32.vlgmr.msra.gmra.mxu1 %v99_v8 }
  0xce   :  { %v105_v22 = vpop.f32.mrf.mxu0 }
  0xcf   :  { %v106_v23 = vadd.f32 %v497_v21, %v105_v22 }
  0xd0   :  { %v522_v24 = vpop.f32.mrf.mxu0  ;;  %v186_v25 = vpop.f32.mrf.mxu1 }
  0xd1   :  { %v187_v26 = vadd.f32 %v186_v25, %v106_v23 }
  0xd2   :  { %v262_v27 = vpop.f32.mrf.mxu0  ;;  %v529_v28 = vpop.f32.mrf.mxu1 }
  0xd3   :  { %v263_v29 = vadd.f32 %v262_v27, %v187_v26 }
  0xd4   :  { %v536_v30 = vpop.f32.mrf.mxu0 }
  0xd6   :  { %v337_v31 = vpop.f32.mrf.mxu1 }
  0xd7   :  { %v338_v32 = vadd.f32 %v337_v31, %v263_v29 }
  0xd8   :  { %v414_v33 = vpop.f32.mrf.mxu0  ;;  %v543_v34 = vpop.f32.mrf.mxu1 }
  0xd9   :  { %v415_v35 = vadd.f32 %v414_v33, %v338_v32 }
  0xda   :  { %v550_v36 = vpop.f32.mrf.mxu0 }
  0xdc   :  { %v487_v37 = vpop.f32.mrf.mxu1 }
  0xdd   :  { %v488_v38 = vadd.f32 %v487_v37, %v415_v35 }
  0xde   :  { %v557_v39 = vpop.f32.mrf.mxu1 }
  0xdf   :  { %492 = vst.msk [vmem:[%s606_s3] sm:$0xff] %vm491_vm3, %v488_v38 }

</bundles_post_ra>
